<compile_context>
chip_gen: v6e
topology: v6e:2x2x1
jax: 0.10.0
libtpu: 0.0.40
codegen_flags: <defaults>
</compile_context>

<pallas_src>
import functools

import jax
import jax.numpy as jnp
from jax.experimental import pallas as pl
from jax.experimental.pallas import tpu as pltpu


def _weight_quant_kernel(x_ref, scale_ref, o_ref, *, lower_bound, upper_bound,
                         multiply_by_inverse):
    x = x_ref[...]
    s = scale_ref[...]                               # (tm, 1) broadcasts over lanes
    if multiply_by_inverse:
        q = jnp.round(x * s)                         # s is precomputed 1/scale
    else:
        q = jnp.round(x / s)                         # round-half-to-even == torch.round
    q = jnp.clip(q, lower_bound, upper_bound)        # torch.clip
    o_ref[...] = q.astype(o_ref.dtype)


def _round_up(v, m):
    return -(-v // m) * m


def weight_quantize(x, scale, upper_bound, lower_bound, *, tm=512, tn=2048,
                    use_reciprocal=False):
    """Pallas equivalent of WeightQuantizer.forward.

    x:     f32[M, N]  (weight matrix)
    scale: f32[M, 1]  (per-output-row scale, broadcasts over N)
    use_reciprocal: opt-in multiply-by-(1/scale) fast path (not bit-exact).
    """
    M, N = x.shape
    assert scale.shape == (M, 1)

    # Clamp tiles to the array; keep (8, 128) alignment whenever the block is
    # smaller than the full extent (full-extent blocks are exempt).
    tm = min(tm, M)
    tn = min(tn, N)
    if tm < M:
        tm = max(8, (tm // 8) * 8)
    if tn < N:
        tn = max(128, (tn // 128) * 128)

    # Megacore (v7x has 2 TCs): if the clamp collapsed the grid to a single
    # program instance, split the row axis so there are >= 2 parallel steps.
    if pl.cdiv(M, tm) == 1 and pl.cdiv(N, tn) == 1 and M >= 16:
        tm_half = _round_up(pl.cdiv(M, 2), 8)
        if tm_half < M:
            tm = tm_half

    grid_m = pl.cdiv(M, tm)
    grid_n = pl.cdiv(N, tn)

    scale_in = scale
    if use_reciprocal:
        # M exact f32 divides in the wrapper; kernel multiplies instead of
        # dividing.  Not bit-exact vs torch.round(x / scale).
        scale_in = 1.0 / scale

    kernel = functools.partial(
        _weight_quant_kernel,
        lower_bound=lower_bound,
        upper_bound=upper_bound,
        multiply_by_inverse=use_reciprocal,
    )

    return pl.pallas_call(
        kernel,
        out_shape=jax.ShapeDtypeStruct((M, N), x.dtype),
        grid_spec=pltpu.PrefetchScalarGridSpec(
            num_scalar_prefetch=0,
            # N innermost: the (tm, 1) scale block index is constant in j, so
            # the pipeline does not re-DMA it on inner-grid steps.
            grid=(grid_m, grid_n),
            in_specs=[
                pl.BlockSpec((tm, tn), lambda i, j: (i, j)),
                pl.BlockSpec((tm, 1), lambda i, j: (i, 0)),
            ],
            out_specs=pl.BlockSpec((tm, tn), lambda i, j: (i, j)),
        ),
        compiler_params=pltpu.CompilerParams(
            dimension_semantics=("parallel", "parallel"),
            # Double-buffered 4 MiB in + 4 MiB out blocks ~= 16 MiB; the bump
            # is mandatory on v5e (16 MiB default scoped VMEM), headroom on
            # v6e/v7x.
            vmem_limit_bytes=32 * 1024 * 1024,
        ),
        cost_estimate=pl.CostEstimate(
            flops=4 * M * N,
            transcendentals=0,
            bytes_accessed=2 * 4 * M * N + 4 * M,
        ),
    )(x, scale_in)


if __name__ == "__main__":
    key = jax.random.PRNGKey(0)
    k_x, k_s = jax.random.split(key)

    upper_bound, lower_bound = 127, -128

    # Aligned "weight" tensor; tile clamp collapses to full extent, then the
    # megacore split kicks in (tm 64 -> 32, grid (2, 1)).
    M, N = 64, 256
    x = jax.random.normal(k_x, (M, N), dtype=jnp.float32)
    scale = (jax.random.uniform(k_s, (M, 1), dtype=jnp.float32) * 0.05 + 0.01)

    out = weight_quantize(x, scale, upper_bound, lower_bound)
    jax.block_until_ready(out)

    ref = jnp.clip(jnp.round(x / scale), lower_bound, upper_bound)
    assert out.shape == x.shape and out.dtype == x.dtype
    assert jnp.array_equal(out, ref), "mismatch vs reference"

    # Ragged shape exercises the implicit edge-block masking path (no pad/slice).
    M2, N2 = 40, 200
    x2 = jax.random.normal(k_x, (M2, N2), dtype=jnp.float32)
    s2 = (jax.random.uniform(k_s, (M2, 1), dtype=jnp.float32) * 0.05 + 0.01)
    out2 = weight_quantize(x2, s2, upper_bound, lower_bound, tm=32, tn=128)
    jax.block_until_ready(out2)
    ref2 = jnp.clip(jnp.round(x2 / s2), lower_bound, upper_bound)
    assert out2.shape == x2.shape and jnp.array_equal(out2, ref2), "ragged mismatch"

    # Opt-in reciprocal fast path (not bit-exact): check within tolerance only.
    out3 = weight_quantize(x, scale, upper_bound, lower_bound, use_reciprocal=True)
    jax.block_until_ready(out3)
    assert jnp.max(jnp.abs(out3 - ref)) <= 1.0, "reciprocal path off by >1 step"

    print("KERNEL_OK")
</pallas_src>

<mosaic_0001>
module attributes {stable_mosaic.version = 11 : i64} {
  func.func @_weight_quant_kernel(%arg0: i32, %arg1: i32, %arg2: memref<32x256xf32, #tpu.memory_space<vmem>>, %arg3: memref<32x1xf32, #tpu.memory_space<vmem>>, %arg4: memref<32x256xf32, #tpu.memory_space<vmem>>) attributes {dimension_semantics = [#tpu.dimension_semantics<parallel>, #tpu.dimension_semantics<parallel>], iteration_bounds = array<i64: 2, 1>, scalar_prefetch = 0 : i64, scratch_operands = 0 : i64, tpu.core_type = #tpu.core_type<tc>, window_params = [{transform_indices = @transform_0, window_bounds = array<i64: 32, 256>}, {transform_indices = @transform_1, window_bounds = array<i64: 32, 1>}, {transform_indices = @transform_2, window_bounds = array<i64: 32, 256>}]} {
    %c0 = arith.constant 0 : index
    %c0_0 = arith.constant 0 : index
    %0 = vector.load %arg2[%c0, %c0_0] : memref<32x256xf32, #tpu.memory_space<vmem>>, vector<32x256xf32>
    %c0_1 = arith.constant 0 : index
    %c0_2 = arith.constant 0 : index
    %1 = vector.load %arg3[%c0_1, %c0_2] : memref<32x1xf32, #tpu.memory_space<vmem>>, vector<32x1xf32>
    %2 = vector.broadcast %1 : vector<32x1xf32> to vector<32x256xf32>
    %3 = arith.divf %0, %2 : vector<32x256xf32>
    %4 = math.roundeven %3 : vector<32x256xf32>
    %c-128_i32 = arith.constant -128 : i32
    %c127_i32 = arith.constant 127 : i32
    %5 = arith.sitofp %c-128_i32 : i32 to f32
    %6 = vector.broadcast %5 : f32 to vector<32x256xf32>
    %7 = arith.maximumf %6, %4 : vector<32x256xf32>
    %8 = arith.sitofp %c127_i32 : i32 to f32
    %9 = vector.broadcast %8 : f32 to vector<32x256xf32>
    %10 = arith.minimumf %9, %7 : vector<32x256xf32>
    %c0_3 = arith.constant 0 : index
    %c0_4 = arith.constant 0 : index
    %11 = vector.load %arg4[%c0_3, %c0_4] : memref<32x256xf32, #tpu.memory_space<vmem>>, vector<32x256xf32>
    tpu.vector_store %arg4[%c0_3, %c0_4], %10 {strides = array<i32>} : memref<32x256xf32, #tpu.memory_space<vmem>>, vector<32x256xf32>,
    return
  }
  func.func @transform_0(%arg0: i32, %arg1: i32) -> (i32, i32) {
    %c0_i32 = arith.constant 0 : i32
    return %arg0, %arg1 : i32, i32
  }
  func.func @transform_1(%arg0: i32, %arg1: i32) -> (i32, i32) {
    %c0_i32 = arith.constant 0 : i32
    %c0_i32_0 = arith.constant 0 : i32
    return %arg0, %c0_i32 : i32, i32
  }
  func.func @transform_2(%arg0: i32, %arg1: i32) -> (i32, i32) {
    %c0_i32 = arith.constant 0 : i32
    return %arg0, %arg1 : i32, i32
  }
}

</mosaic_0001>

<bundles_post_ra>
// kernel: tpu_custom_call.1
= control target key start
LH: loop header
LB: loop body
LE: loop exit
PB: predicated region body
PF: predicated region fallthrough
CT: control target
= control target key end

     0   :  { %7 = vsyncpa [#allocation3], 0  ;;  %s888_s0 = inlined_call_operand.hbm [shape: f32[64,256], index: 0, kind: input, shape index: {}]   ;;  %s889_s1 = inlined_call_operand.vmem [shape: f32[64,1], index: 1, kind: input, shape index: {}]   ;;  %s890_s2 = inlined_call_operand.hbm [shape: f32[64,256], index: 2, kind: output, shape index: {}]  }
   0x1   :  { %9 = vsyncpa [#allocation3 + $0x1], 0 }
   0x2   :  { %10 = vsyncpa [#allocation4], 0 }
   0x3   :  { %12 = vsyncpa [#allocation4 + $0x1], 0  ;;  %s695_s9 = smov 0   ;;  %s697_s10 = smov 0  }
   0x4   :  { %s699_s11 = smov 0   ;;  %s701_s12 = smov 0  }
   0x5   :  { %s703_s13 = smov 0   ;;  %s705_s14 = smov 0  }
   0x6 LB: > { %s399_s15 = sadd.s32 4294967295, %s671_s14   ;;  %s400_s16 = sadd.s32 4294967294, %s671_s14   ;;  %s671_s14 = sphi %s705_s14, %s18_s14   ;;  %s667_s13 = sphi %s703_s13, %s907_s13   ;;  %s663_s12 = sphi %s701_s12, %s906_s12   ;;  %s659_s11 = sphi %s699_s11, %s905_s11   ;;  %s655_s10 = sphi %s697_s10, %s904_s10   ;;  %s651_s9 = sphi %s695_s9, %s903_s9  }
   0x7   : > { %s30_s17 = sadd.s32 1, %s667_s13  ;;  %s39_s18 = sadd.s32 1, %s659_s11 }
   0x8   : > { %p32_p0 = scmp.ge.s32.totalorder %s30_s17, 2  ;;  %p46_p1 = scmp.ne.s32.totalorder %s659_s11, %s655_s10 }
   0x9   : > { %p47_p2 = scmp.eq.s32.totalorder %s671_s14, 0  ;;  %p52_p3 = scmp.ne.s32.totalorder %s655_s10, %s651_s9 }
   0xa   : > { %s909_s17 = smov (%p32_p0, %s30_s17), 0  ;;  %p53_p5 = scmp.eq.s32.totalorder %s399_s15, 0 }
   0xb   : > { %p736_p4 = por %p47_p2, %p46_p1  ;;  %s34_s20 = ssub.s32 %s667_s13, %s909_s17 }
   0xc   : > { %p104_p6 = scmp.eq.s32.totalorder %s399_s15, 1  ;;  %p37_p7 = scmp.eq.s32.totalorder %s34_s20, 0 }
   0xd   : > { %p742_p8 = por %p53_p5, %p52_p3  ;;  %p110_p10 = scmp.eq.s32.totalorder %s400_s16, 1 }
   0xe   : > { %p746_p9 = por %p104_p6, %p46_p1  ;;  %p498_p13 = scmp.lt.s32.totalorder %s671_s14, 2 }
   0xf   : > { %s751_s23 = scalar_select %p37_p7, %s659_s11, %s39_s18  }
  0x10   : > { %p753_p11 = por %p110_p10, %p52_p3  ;;  %s130_s25 = sand.u32 1, %s659_s11  }
  0x11   : > { %s403_s26 = sshll.u32 %s130_s25, 6  ;;  %s419_s27 = sshll.u32 %s667_s13, 10 }
  0x12   : > { %s143_s30 = scalar_lea.hbm %s888_s0, %s419_s27  ;;  %s134_s3 = scalar_lea.vmem [#allocation2], %s403_s26 }
  0x13   : > { %s144_s4 = sshll.u32 %s134_s3, 4  ;;  %p766_p0 = pnand %p498_p13, %p736_p4  ;;  %s145_s4 = int_to_ptr.vmem [resolvable:$true] %s144_s4 }
  0x14   : > { %p407_p1 = scmp.ge.s32.totalorder %s671_s14, 1  ;;  %s131_s6 = scalar_lea.sflag [#allocation3], %s130_s25 }
  0x15   : > { %p565_p2 = pneg %p766_p0  ;;  %s576_s7 = scalar_lea.vmem %s145_s4, 1024 }
  0x16   : > { %p577_p3 = scmp.ne.s32.totalorder %s145_s4, %s576_s7  ;;  %s673_s8 = smov [#allocation2]  }
  0x17   : > { %s581_s15 = sshll.u32 %s673_s8, 4  ;;  %s582_s15 = int_to_ptr.vmem [resolvable:$false] %s581_s15 }
  0x18   : > { %p579_p5 = pnand %p577_p3, %p565_p2  ;;  %s583_s16 = scalar_lea.vmem %s582_s15, 2048 }
  0x19   : > { %p584_p7 = scmp.lt.s32.totalorder %s145_s4, %s582_s15  ;;  %p585_p10 = scmp.lt.s32.totalorder %s583_s16, %s576_s7 }
  0x1a   : > { %p580_p6 = pneg %p579_p5 }
  0x1b   : > { %p586_p12 = por %p585_p10, %p584_p7 }
  0x1d   : > { %p587_p4 = pnand %p586_p12, %p580_p6 }
  0x1f   : > { %590 = shalt.err (!%p587_p4)
}
  0x20   : > { %s674_s18 = smov 256   ;;  %s675_s19 = smov 16  }
  0x21   : > { %493 = dma.hbm_to_vmem [thread:$0]  (!%p766_p0), %s143_s30, 1024, %s145_s4, %s131_s6, %s674_s18, %s674_s18, %s675_s19  }
  0x22   : > { %p161_p13 = scmp.lt.s32.totalorder %s671_s14, 3 }
  0x24   : > { %p162_p2 = pnand %p407_p1, %p161_p13 }
  0x25   : > { %s779_s20 = sand.u32 (!%p162_p2), 1, %s655_s10  }
  0x26   : > { %165 = sbr.rel (%p162_p2) target bundleno = 232 (0xe8), region = 28  ;;  %s408_s25 = sshll.u32 (!%p162_p2), %s779_s20, 6 }
  0x27   : > { %s168_s26 = scalar_lea.sflag (!%p162_p2), [#allocation3], %s779_s20  ;;  %s785_s27 = scalar_lea.vmem (!%p162_p2), [#allocation2], %s408_s25 }
  0x2b   : > { %642 = dma.done.wait (%p742_p8), %s168_s26, 1024  }
  0x2c   : > { %644 = vsyncadd (%p742_p8), %s168_s26, 4294966272  ;;  %s410_s28 = sshll.u32 %s663_s12, 2  ;;  %v676_v0 = vmov 0   ;;  %v211_v9 = vld [vmem:[%s785_s27 + $0x20] sm:$0xff]  ;;  %v212_v10 = vld [vmem:[%s785_s27 + $0x28] sm:$0xff]  ;;  %s823_s21 = scalar_lea.vmem [#allocation5], %s408_s25 }
  0x2d   : > { %554 = vset.pattern.permute.xlu1 %v676_v0  ;;  %553 = vset.pattern.permute.xlu0 %v676_v0  ;;  %p200_p12 = scmp.lt.s32.totalorder %s410_s28, 7  ;;  %v207_v11 = vld [vmem:[%s785_s27] sm:$0xff]  ;;  %v208_v13 = vld [vmem:[%s785_s27 + $0x8] sm:$0xff]  ;;  %v213_v26 = vld [vmem:[%s785_s27 + $0x30] sm:$0xff]  ;;  %s421_s5 = sshll.u32 %s663_s12, 10 }
  0x2e   : > { %v214_v36 = vld [vmem:[%s785_s27 + $0x38] sm:$0xff]  ;;  %v209_v55 = vld [vmem:[%s785_s27 + $0x10] sm:$0xff]  ;;  %s300_s6 = sshll.u32 %s823_s21, 4  ;;  %s836_s15 = scalar_lea.hbm %s890_s2, %s421_s5  ;;  %s838_s6 = int_to_ptr.vmem [resolvable:$true] %s300_s6 }
  0x2f   : > { %s911_s28 = smov (!%p200_p12, %s410_s28), 7  ;;  %v210_v0 = vld [vmem:[%s785_s27 + $0x18] sm:$0xff]  ;;  %s284_s16 = scalar_lea.sflag [#allocation4], %s779_s20 }
  0x30   : > { %s411_s29 = sshll.u32 %s911_s28, 3  ;;  %s591_s12 = scalar_lea.vmem %s838_s6, 1024 }
  0x31   : > { %s203_s4 = scalar_lea.vmem %s889_s1, %s411_s29  ;;  %p592_p8 = scmp.ne.s32.totalorder %s838_s6, %s591_s12 }
  0x32   : > { %v217_v1 = vld [vmem:[%s203_s4 + $0x10] sm:$0xff]  ;;  %v215_v2 = vld [vmem:[%s203_s4] sm:$0xff]  ;;  %v218_v3 = vld [vmem:[%s203_s4 + $0x18] sm:$0xff]  ;;  %s677_s18 = smov [#allocation5]  }
  0x33   : > { %231 = vperm.xlu1 %554, %v217_v1   ;;  %221 = vperm.xlu0 %553, %v215_v2   ;;  %v216_v4 = vld [vmem:[%s203_s4 + $0x8] sm:$0xff]  ;;  %p593_p0 = pnand %p592_p8, %p746_p9  ;;  %s595_s19 = sshll.u32 %s677_s18, 4  ;;  %s596_s19 = int_to_ptr.vmem [resolvable:$false] %s595_s19 }
  0x34   : > { %s597_s25 = scalar_lea.vmem %s596_s19, 2048  ;;  %p598_p3 = scmp.lt.s32.totalorder %s838_s6, %s596_s19 }
  0x35   : > { %p594_p1 = pneg %p593_p0  ;;  %p599_p5 = scmp.lt.s32.totalorder %s597_s25, %s591_s12 }
  0x37   : > { %236 = vperm.xlu1 %554, %v218_v3   ;;  %226 = vperm.xlu0 %553, %v216_v4   ;;  %p600_p6 = por %p599_p5, %p598_p3 }
  0x39   : > { %p601_p7 = pnand %p600_p6, %p594_p1 }
  0xae   : > { %v232_v5 = vpop.permute.xlu1 %231  ;;  %v222_v6 = vpop.permute.xlu0 %221 }
  0xaf   : > { %555 = vrcp.f32 %v232_v5 }
  0xb0   : > { %557 = vrcp.f32 %v222_v6 }
  0xb2   : > { %v237_v7 = vpop.permute.xlu1 %236  ;;  %v227_v8 = vpop.permute.xlu0 %226 }
  0xb3   : > { %559 = vrcp.f32 %v237_v7 }
  0xb4   : > { %561 = vrcp.f32 %v227_v8 }
  0xbc   : > { %v556_v12 = vpop.eup %555 }
  0xbd   : > { %v558_v14 = vpop.eup %557  ;;  %v246_v15 = vmul.f32 %v556_v12, %v211_v9  ;;  %v247_v16 = vmul.f32 %v556_v12, %v212_v10 }
  0xbe   : > { %v240_v17 = vmul.f32 %v558_v14, %v207_v11  ;;  %v241_v21 = vmul.f32 %v558_v14, %v208_v13 }
  0xbf   : > { %v454_v18 = vand.u32 2147483647, %v246_v15  ;;  %v456_v19 = vcvt.f32.s32 %v246_v15  ;;  %v462_v20 = vand.u32 2147483647, %v247_v16  ;;  %v464_v23 = vcvt.f32.s32 %v247_v16 }
  0xc0   : > { %v560_v22 = vpop.eup %559  ;;  %v422_v24 = vand.u32 2147483647, %v240_v17  ;;  %v424_v25 = vcvt.f32.s32 %v240_v17  ;;  %v459_v28 = vand.u32 2147483648, %v246_v15  ;;  %v467_v31 = vand.u32 2147483648, %v247_v16 }
  0xc1   : > { %v457_v27 = vcvt.s32.f32 %v456_v19  ;;  %vm800_vm0 = vcmp.lt.f32.partialorder %v454_v18, 8388608.0  ;;  %v465_v30 = vcvt.s32.f32 %v464_v23  ;;  %vm804_vm1 = vcmp.lt.f32.partialorder %v462_v20, 8388608.0  ;;  %v562_v50 = vpop.eup %561 }
  0xc2   : > { %v425_v32 = vcvt.s32.f32 %v424_v25  ;;  %v432_v35 = vcvt.f32.s32 %v241_v21  ;;  %v249_v37 = vmul.f32 %v560_v22, %v213_v26  ;;  %vm809_vm2 = vcmp.lt.f32.partialorder %v422_v24, 8388608.0 }
  0xc3   : > { %v458_v33 = vand.u32 2147483647, %v457_v27  ;;  %v466_v38 = vand.u32 2147483647, %v465_v30  ;;  %v427_v41 = vand.u32 2147483648, %v240_v17  ;;  %v435_v48 = vand.u32 2147483648, %v241_v21 }
  0xc4   : > { %v426_v40 = vand.u32 2147483647, %v425_v32  ;;  %v430_v43 = vand.u32 2147483647, %v241_v21  ;;  %v433_v44 = vcvt.s32.f32 %v432_v35  ;;  %v472_v45 = vcvt.f32.s32 %v249_v37 }
  0xc5   : > { %v460_v42 = vor.u32 %v459_v28, %v458_v33  ;;  %v468_v46 = vor.u32 %v467_v31, %v466_v38  ;;  %v250_v49 = vmul.f32 %v560_v22, %v214_v36  ;;  %v470_v53 = vand.u32 2147483647, %v249_v37 }
  0xc6   : > { %v428_v47 = vor.u32 %v427_v41, %v426_v40  ;;  %v434_v52 = vand.u32 2147483647, %v433_v44  ;;  %v473_v54 = vcvt.s32.f32 %v472_v45  ;;  %v475_v59 = vand.u32 2147483648, %v249_v37 }
  0xc7   : > { %v461_v51 = vsel %vm800_vm0, %v460_v42, %v246_v15  ;;  %v469_v56 = vsel %vm804_vm1, %v468_v46, %v247_v16  ;;  %vm431_vm3 = vcmp.lt.f32.partialorder %v430_v43, 8388608.0  ;;  %v480_v2 = vcvt.f32.s32 %v250_v49 }
  0xc8   : > { %v263_v57 = vmax.f32 %v461_v51, -128.0  ;;  %v429_v58 = vsel %vm809_vm2, %v428_v47, %v240_v17  ;;  %v264_v60 = vmax.f32 %v469_v56, -128.0  ;;  %v436_v61 = vor.u32 %v435_v48, %v434_v52 }
  0xc9   : > { %v259_v62 = vmax.f32 %v429_v58, -128.0  ;;  %v474_v63 = vand.u32 2147483647, %v473_v54  ;;  %v243_v3 = vmul.f32 %v562_v50, %v209_v55  ;;  %vm471_vm4 = vcmp.lt.f32.partialorder %v470_v53, 8388608.0 }
  0xca   : > { %v271_v1 = vmin.f32 %v263_v57, 127.0  ;;  %v272_v4 = vmin.f32 %v264_v60, 127.0  ;;  %v437_v5 = vsel %vm431_vm3, %v436_v61, %v241_v21  ;;  %v481_v9 = vcvt.s32.f32 %v480_v2 }
  0xcb   : > { %v267_v6 = vmin.f32 %v259_v62, 127.0  ;;  %v476_v7 = vor.u32 %v475_v59, %v474_v63  ;;  %v260_v8 = vmax.f32 %v437_v5, -128.0  ;;  %v244_v10 = vmul.f32 %v562_v50, %v210_v0 }
  0xcc   : > { %279 = vst [vmem:[%s823_s21 + $0x20] sm:$0xff] %v271_v1  ;;  %280 = vst [vmem:[%s823_s21 + $0x28] sm:$0xff] %v272_v4  ;;  %v478_v12 = vand.u32 2147483647, %v250_v49  ;;  %v440_v13 = vcvt.f32.s32 %v243_v3  ;;  %v482_v15 = vand.u32 2147483647, %v481_v9 }
  0xcd   : > { %275 = vst [vmem:[%s823_s21] sm:$0xff] %v267_v6  ;;  %v477_v11 = vsel %vm471_vm4, %v476_v7, %v249_v37  ;;  %v268_v14 = vmin.f32 %v260_v8, 127.0  ;;  %v483_v16 = vand.u32 2147483648, %v250_v49  ;;  %v448_v19 = vcvt.f32.s32 %v244_v10 }
  0xce   : > { %v265_v17 = vmax.f32 %v477_v11, -128.0  ;;  %v441_v18 = vcvt.s32.f32 %v440_v13  ;;  %v438_v22 = vand.u32 2147483647, %v243_v3  ;;  %vm479_vm5 = vcmp.lt.f32.partialorder %v478_v12, 8388608.0 }
  0xcf   : > { %276 = vst [vmem:[%s823_s21 + $0x8] sm:$0xff] %v268_v14  ;;  %v484_v20 = vor.u32 %v483_v16, %v482_v15  ;;  %v443_v24 = vand.u32 2147483648, %v243_v3  ;;  %v449_v25 = vcvt.s32.f32 %v448_v19  ;;  %v446_v27 = vand.u32 2147483647, %v244_v10 }
  0xd0   : > { %v273_v21 = vmin.f32 %v265_v17, 127.0  ;;  %v442_v23 = vand.u32 2147483647, %v441_v18  ;;  %v451_v31 = vand.u32 2147483648, %v244_v10  ;;  %vm439_vm6 = vcmp.lt.f32.partialorder %v438_v22, 8388608.0 }
  0xd1   : > { %v485_v26 = vsel %vm479_vm5, %v484_v20, %v250_v49  ;;  %v450_v30 = vand.u32 2147483647, %v449_v25  ;;  %vm447_vm7 = vcmp.lt.f32.partialorder %v446_v27, 8388608.0 }
  0xd2   : > { %281 = vst [vmem:[%s823_s21 + $0x30] sm:$0xff] %v273_v21  ;;  %v266_v28 = vmax.f32 %v485_v26, -128.0  ;;  %v444_v29 = vor.u32 %v443_v24, %v442_v23 }
  0xd3   : > { %v452_v34 = vor.u32 %v451_v31, %v450_v30 }
  0xd4   : > { %v274_v32 = vmin.f32 %v266_v28, 127.0  ;;  %v445_v33 = vsel %vm439_vm6, %v444_v29, %v243_v3 }
  0xd5   : > { %v261_v35 = vmax.f32 %v445_v33, -128.0  ;;  %v453_v36 = vsel %vm447_vm7, %v452_v34, %v244_v10 }
  0xd6   : > { %282 = vst [vmem:[%s823_s21 + $0x38] sm:$0xff] %v274_v32  ;;  %v262_v37 = vmax.f32 %v453_v36, -128.0 }
  0xd7   : > { %v269_v38 = vmin.f32 %v261_v35, 127.0 }
  0xd8   : > { %v270_v39 = vmin.f32 %v262_v37, 127.0 }
  0xd9   : > { %277 = vst [vmem:[%s823_s21 + $0x10] sm:$0xff] %v269_v38 }
  0xda   : > { %278 = vst [vmem:[%s823_s21 + $0x18] sm:$0xff] %v270_v39 }
  0xdb   : > { %604 = shalt.err (!%p601_p7)
}
  0xdc   : > { %s605_s26 = scalar_lea.hbm %s836_s15, 1024  ;;  %s609_s29 = scalar_lea.hbm %s890_s2, 2048 }
  0xdd   : > { %p606_p10 = scmp.ne.s32.totalorder %s836_s15, %s605_s26  ;;  %p610_p2 = scmp.lt.s32.totalorder %s836_s15, %s890_s2 }
  0xde   : > { %p611_p12 = scmp.lt.s32.totalorder %s609_s29, %s605_s26 }
  0xdf   : > { %p607_p4 = pnand %p606_p10, %p746_p9 }
  0xe0   : > { %p612_p8 = por %p611_p12, %p610_p2 }
  0xe1   : > { %p608_p13 = pneg %p607_p4 }
  0xe3   : > { %p613_p0 = pnand %p612_p8, %p608_p13 }
  0xe5   : > { %616 = shalt.err (!%p613_p0)
}
  0xe6   : > { %s678_s4 = smov 256   ;;  %s679_s21 = smov 16  }
  0xe7   : > { %488 = dma.vmem_to_hbm [thread:$0]  (%p746_p9), %s838_s6, 1024, %s836_s15, %s284_s16, %s678_s4, %s678_s4, %s679_s21  }
  0xe8 PF: > { %s315_s5 = sand.u32 1, %s651_s9   ;;  %p902_p1 = scmp.ge.s32.totalorder %s671_s14, 2 }
  0xe9   : > { %s316_s7 = scalar_lea.sflag [#allocation4], %s315_s5 }
  0xea   : > { %p495_p3 = pnand %p902_p1, %p753_p11 }
  0xec   : > { %p496_p5 = pneg %p495_p3 }
  0xee   : > { %646 = dma.done.wait (%p496_p5), %s316_s7, 1024  }
  0xef   : > { %648 = vsyncadd (%p496_p5), %s316_s7, 4294966272  ;;  %s18_s14 = sadd.s32 1, %s671_s14   ;;  %s903_s9 = smov %s655_s10 }
  0xf0   : > { %p15_p6 = scmp.ge.s32.totalorder %s18_s14, 4   ;;  %s904_s10 = smov %s659_s11 }
  0xf1   : > { %s905_s11 = smov %s751_s23  ;;  %s906_s12 = smov %s667_s13 }
  0xf2   : > { %s907_s13 = smov %s909_s17  ;;  %17 = sbr.rel (!%p15_p6) target bundleno = 6 (0x6), region = 76 }
  0xf7   :  { %321 = vsyncpa [#allocation3], 1 }
  0xf8   :  { %323 = vsyncpa [#allocation3 + $0x1], 1 }
  0xf9   :  { %324 = vsyncpa [#allocation4], 1 }
  0xfa   :  { %326 = vsyncpa [#allocation4 + $0x1], 1 }

</bundles_post_ra>
